<compile_context>
chip_gen: v5e
topology: v5e:2x2
jax: 0.10.0
libtpu: 0.0.40
codegen_flags: <defaults>
</compile_context>

<pallas_src>
from functools import partial

import jax
import jax.numpy as jnp
from jax.experimental import pallas as pl
from jax.experimental.pallas import tpu as pltpu

EPS = 1e-5


def _round_up(n, m):
    return ((n + m - 1) // m) * m


def _sublayer_connection_kernel(x_ref, lnw_ref, lnb_ref, w_ref, b_ref, o_ref, nx_ref):
    """One (tm, tn) output tile of  out = x + Linear(LayerNorm(x)).

    x_ref   : (tm, H)   activations (native dtype), resident across the j axis
    lnw/lnb : (1, H)    f32 LayerNorm affine params
    w_ref   : (H, tn)   bf16 column slab of W^T
    b_ref   : (1, tn)   f32 Linear-bias slice
    o_ref   : (tm, tn)  output tile
    nx_ref  : (tm, H)   bf16 scratch holding LayerNorm(x) for the current row tile
    """
    j = pl.program_id(1)
    tn = o_ref.shape[-1]

    # LayerNorm once per row tile (j == 0), reused for every weight-column slab.
    @pl.when(j == 0)
    def _():
        xf = x_ref[...].astype(jnp.float32)
        mean = jnp.mean(xf, axis=-1, keepdims=True)
        xc = xf - mean
        var = jnp.mean(xc * xc, axis=-1, keepdims=True)  # biased var (PyTorch)
        inv = jax.lax.rsqrt(var + EPS)
        nx_ref[...] = (xc * inv * lnw_ref[...] + lnb_ref[...]).astype(jnp.bfloat16)

    # sublayer: Linear(H, H) column slab — bf16 operands, f32 MXU accumulation.
    y = jnp.dot(nx_ref[...], w_ref[...],
                preferred_element_type=jnp.float32) + b_ref[...]

    # dropout (identity in eval) + residual.  The residual slice is re-read /
    # re-cast from the resident x tile so no f32 copy of x stays live across
    # the matmul.
    start = pl.multiple_of(j * tn, tn)
    x_slice = x_ref[:, pl.ds(start, tn)].astype(jnp.float32)
    o_ref[...] = (x_slice + y).astype(o_ref.dtype)


def _vmem_budget_bytes():
    """Usable VMEM budget: ~75% of physical, never above 100 MiB.
    v7x (64 MiB) -> ~48 MiB;  v5e/v6e (128 MiB) -> ~96-100 MiB."""
    try:
        info = pltpu.get_tpu_info()
        cap = int(getattr(info, "vmem_capacity_bytes", 128 << 20))
    except Exception:
        cap = 128 << 20
    return min(cap * 3 // 4, 100 << 20)


def _vmem_need(tm, tn, H, xb):
    return (2 * tm * H * xb          # x tile, double-buffered
            + 2 * tm * tn * xb       # out tile, double-buffered
            + 2 * H * tn * 2         # bf16 weight column slab, double-buffered
            + tm * H * 2             # LayerNorm(x) bf16 scratch
            + 3 * tm * H * 4         # f32 LN intermediates
            + 8 * (H + tn) * 4       # small params
            + (2 << 20))             # slack


def _pick_tiles(N, H, xb, budget):
    # Output-column tile: multiple of 128 (lanes) / 256 (v6e+/v7x MXU width),
    # must divide H so the weight slab BlockSpec is exact.
    if H % 128 == 0 and H > 512:
        tn = 512
        while H % tn != 0:
            tn -= 128
    else:
        tn = H
    # Row tile: largest candidate that fits the VMEM budget.
    tm = 16
    for cand in (1024, 512, 256, 128, 64, 32, 16):
        if _vmem_need(cand, tn, H, xb) <= budget:
            tm = cand
            break
    tm = max(16, min(tm, _round_up(N, 16)))   # don't over-allocate for tiny inputs
    return tm, tn


@jax.jit
def sublayer_connection(x, ln_weight, ln_bias, lin_weight, lin_bias):
    """out = x + dropout(Linear(LayerNorm(x))), dropout in eval (identity) mode.

    x: (B, S, H).  lin_weight: (H, H) in PyTorch (out, in) convention.
    """
    B, S, H = x.shape
    N = B * S
    xb = jnp.dtype(x.dtype).itemsize

    budget = _vmem_budget_bytes()
    tm, tn = _pick_tiles(N, H, xb, budget)
    gi = pl.cdiv(N, tm)        # ragged last row block handled by Pallas (no pad copy)
    gj = H // tn

    x2 = x.reshape(N, H)
    lnw = ln_weight.reshape(1, H).astype(jnp.float32)
    lnb = ln_bias.reshape(1, H).astype(jnp.float32)
    w_t = lin_weight.T.astype(jnp.bfloat16)        # (in, out) bf16 for the MXU
    b = lin_bias.reshape(1, H).astype(jnp.float32)

    vmem_limit = int(min(budget, max(_vmem_need(tm, tn, H, xb), 32 << 20)))

    cost = pl.CostEstimate(
        flops=2 * N * H * H + 10 * N * H,
        transcendentals=0,
        bytes_accessed=2 * N * H * xb + gi * H * H * 2 + 8 * H * 4,
    )

    single = dict(pipeline_mode=pl.Buffered(1))    # constant operands: 1 buffer
    colmode = single if gj == 1 else {}            # column-varying operands: default (2)

    out = pl.pallas_call(
        _sublayer_connection_kernel,
        out_shape=jax.ShapeDtypeStruct((N, H), x.dtype),
        grid_spec=pltpu.PrefetchScalarGridSpec(
            num_scalar_prefetch=0,
            grid=(gi, gj),
            in_specs=[
                pl.BlockSpec((tm, H), lambda i, j: (i, 0)),             # x rows (resident across j)
                pl.BlockSpec((1, H), lambda i, j: (0, 0), **single),    # LN weight
                pl.BlockSpec((1, H), lambda i, j: (0, 0), **single),    # LN bias
                pl.BlockSpec((H, tn), lambda i, j: (0, j), **colmode),  # W^T column slab (bf16)
                pl.BlockSpec((1, tn), lambda i, j: (0, j), **colmode),  # Linear bias slice
            ],
            out_specs=pl.BlockSpec((tm, tn), lambda i, j: (i, j)),
            scratch_shapes=[pltpu.VMEM((tm, H), jnp.bfloat16)],         # LayerNorm(x) cache
        ),
        compiler_params=pltpu.CompilerParams(
            dimension_semantics=("parallel", "arbitrary"),
            vmem_limit_bytes=vmem_limit),
        cost_estimate=cost,
    )(x2, lnw, lnb, w_t, b)

    return out.reshape(B, S, H)


def _reference(x, ln_weight, ln_bias, lin_weight, lin_bias):
    # Matches kernel numerics: f32 LayerNorm/residual, bf16 matmul operands with
    # f32 accumulation (deliberate divergence from the pure-f32 PyTorch Linear).
    xf = x.astype(jnp.float32)
    mean = jnp.mean(xf, axis=-1, keepdims=True)
    var = jnp.mean((xf - mean) ** 2, axis=-1, keepdims=True)
    nx = (xf - mean) * jax.lax.rsqrt(var + EPS) * ln_weight + ln_bias
    y = jnp.dot(nx.astype(jnp.bfloat16), lin_weight.T.astype(jnp.bfloat16),
                preferred_element_type=jnp.float32) + lin_bias
    return (xf + y).astype(x.dtype)


if __name__ == "__main__":
    B, S, H = 2, 8, 128   # small shapes; H mapped to the 128-lane axis
    key = jax.random.PRNGKey(0)
    kx, klnw, kw, kb = jax.random.split(key, 4)

    x = jax.random.normal(kx, (B, S, H), dtype=jnp.float32)

    # LayerNorm params: weight ~ U[0,1), bias = 0  (module's reset_parameters)
    ln_weight = jax.random.uniform(klnw, (H,), dtype=jnp.float32)
    ln_bias = jnp.zeros((H,), dtype=jnp.float32)

    # Representative sublayer: Linear(H, H), deterministic init
    bound = 1.0 / (H ** 0.5)
    lin_weight = jax.random.uniform(kw, (H, H), minval=-bound, maxval=bound,
                                    dtype=jnp.float32)
    lin_bias = jax.random.uniform(kb, (H,), minval=-bound, maxval=bound,
                                  dtype=jnp.float32)

    out = sublayer_connection(x, ln_weight, ln_bias, lin_weight, lin_bias)
    out = jax.block_until_ready(out)

    ref = _reference(x, ln_weight, ln_bias, lin_weight, lin_bias)
    assert out.shape == (B, S, H)
    assert jnp.allclose(out, ref, atol=2e-3, rtol=2e-3), "mismatch vs reference"

    print("KERNEL_OK")
</pallas_src>

<mosaic_0001>
module attributes {stable_mosaic.version = 11 : i64} {
  func.func @_sublayer_connection_kernel(%arg0: i32, %arg1: i32, %arg2: memref<16x128xf32, #tpu.memory_space<vmem>>, %arg3: memref<1x128xf32, #tpu.memory_space<vmem>>, %arg4: memref<1x128xf32, #tpu.memory_space<vmem>>, %arg5: memref<128x128xbf16, #tpu.memory_space<vmem>>, %arg6: memref<1x128xf32, #tpu.memory_space<vmem>>, %arg7: memref<16x128xf32, #tpu.memory_space<vmem>>, %arg8: memref<16x128xbf16, #tpu.memory_space<vmem>>) attributes {dimension_semantics = [#tpu.dimension_semantics<parallel>, #tpu.dimension_semantics<arbitrary>], iteration_bounds = array<i64: 1, 1>, scalar_prefetch = 0 : i64, scratch_operands = 1 : i64, tpu.core_type = #tpu.core_type<tc>, window_params = [{transform_indices = @transform_0, window_bounds = array<i64: 16, 128>}, {pipeline_mode = #tpu.pipeline_mode<synchronous>, transform_indices = @transform_1, window_bounds = array<i64: 1, 128>}, {pipeline_mode = #tpu.pipeline_mode<synchronous>, transform_indices = @transform_2, window_bounds = array<i64: 1, 128>}, {pipeline_mode = #tpu.pipeline_mode<synchronous>, transform_indices = @transform_3, window_bounds = array<i64: 128, 128>}, {pipeline_mode = #tpu.pipeline_mode<synchronous>, transform_indices = @transform_4, window_bounds = array<i64: 1, 128>}, {transform_indices = @transform_5, window_bounds = array<i64: 16, 128>}]} {
    %c0_i32 = arith.constant 0 : i32
    %0 = arith.cmpi eq, %arg1, %c0_i32 : i32
    %1 = arith.extui %0 : i1 to i32
    %c0_i32_0 = arith.constant 0 : i32
    %2 = arith.cmpi ne, %1, %c0_i32_0 : i32
    scf.if %2 {
      %c0_9 = arith.constant 0 : index
      %c0_10 = arith.constant 0 : index
      %15 = vector.load %arg2[%c0_9, %c0_10] : memref<16x128xf32, #tpu.memory_space<vmem>>, vector<16x128xf32>
      %cst_11 = arith.constant dense<0.000000e+00> : vector<16xf32>
      %16 = vector.multi_reduction <add>, %15, %cst_11 [1] : vector<16x128xf32> to vector<16xf32>
      %17 = vector.shape_cast %16 : vector<16xf32> to vector<16x1xf32>
      %cst_12 = arith.constant 1.280000e+02 : f32
      %18 = vector.broadcast %cst_12 : f32 to vector<16x1xf32>
      %19 = arith.divf %17, %18 : vector<16x1xf32>
      %20 = vector.broadcast %19 : vector<16x1xf32> to vector<16x128xf32>
      %21 = arith.subf %15, %20 : vector<16x128xf32>
      %22 = arith.mulf %21, %21 : vector<16x128xf32>
      %cst_13 = arith.constant dense<0.000000e+00> : vector<16xf32>
      %23 = vector.multi_reduction <add>, %22, %cst_13 [1] : vector<16x128xf32> to vector<16xf32>
      %24 = vector.shape_cast %23 : vector<16xf32> to vector<16x1xf32>
      %cst_14 = arith.constant 1.280000e+02 : f32
      %25 = vector.broadcast %cst_14 : f32 to vector<16x1xf32>
      %26 = arith.divf %24, %25 : vector<16x1xf32>
      %cst_15 = arith.constant 9.99999974E-6 : f32
      %27 = vector.broadcast %cst_15 : f32 to vector<16x1xf32>
      %28 = arith.addf %26, %27 : vector<16x1xf32>
      %29 = math.rsqrt %28 : vector<16x1xf32>
      %30 = vector.broadcast %29 : vector<16x1xf32> to vector<16x128xf32>
      %31 = arith.mulf %21, %30 : vector<16x128xf32>
      %c0_16 = arith.constant 0 : index
      %c0_17 = arith.constant 0 : index
      %32 = vector.load %arg3[%c0_16, %c0_17] : memref<1x128xf32, #tpu.memory_space<vmem>>, vector<1x128xf32>
      %33 = vector.broadcast %32 : vector<1x128xf32> to vector<16x128xf32>
      %34 = arith.mulf %31, %33 : vector<16x128xf32>
      %c0_18 = arith.constant 0 : index
      %c0_19 = arith.constant 0 : index
      %35 = vector.load %arg4[%c0_18, %c0_19] : memref<1x128xf32, #tpu.memory_space<vmem>>, vector<1x128xf32>
      %36 = vector.broadcast %35 : vector<1x128xf32> to vector<16x128xf32>
      %37 = arith.addf %34, %36 : vector<16x128xf32>
      %38 = arith.truncf %37 : vector<16x128xf32> to vector<16x128xbf16>
      %c0_20 = arith.constant 0 : index
      %c0_21 = arith.constant 0 : index
      %39 = vector.load %arg8[%c0_20, %c0_21] : memref<16x128xbf16, #tpu.memory_space<vmem>>, vector<16x128xbf16>
      tpu.vector_store %arg8[%c0_20, %c0_21], %38 {strides = array<i32>} : memref<16x128xbf16, #tpu.memory_space<vmem>>, vector<16x128xbf16>,
    } else {
    }
    %c0 = arith.constant 0 : index
    %c0_1 = arith.constant 0 : index
    %3 = vector.load %arg8[%c0, %c0_1] : memref<16x128xbf16, #tpu.memory_space<vmem>>, vector<16x128xbf16>
    %c0_2 = arith.constant 0 : index
    %c0_3 = arith.constant 0 : index
    %4 = vector.load %arg5[%c0_2, %c0_3] : memref<128x128xbf16, #tpu.memory_space<vmem>>, vector<128x128xbf16>
    %cst = arith.constant dense<0.000000e+00> : vector<16x128xf32>
    %5 = tpu.matmul %3, %4, %cst {dimension_numbers = #tpu.dot_dimension_numbers<[1], [0], [0], [1], [0, 0, 1, 1], [], []>} : vector<16x128xbf16>, vector<128x128xbf16>, vector<16x128xf32> -> vector<16x128xf32>
    %c0_4 = arith.constant 0 : index
    %c0_5 = arith.constant 0 : index
    %6 = vector.load %arg6[%c0_4, %c0_5] : memref<1x128xf32, #tpu.memory_space<vmem>>, vector<1x128xf32>
    %7 = vector.broadcast %6 : vector<1x128xf32> to vector<16x128xf32>
    %8 = arith.addf %5, %7 : vector<16x128xf32>
    %c128_i32 = arith.constant 128 : i32
    %9 = arith.muli %arg1, %c128_i32 : i32
    %10 = tpu.assume_multiple %9, 128 : i32
    %c0_6 = arith.constant 0 : index
    %11 = arith.index_cast %10 : i32 to index
    %12 = vector.load %arg2[%c0_6, %11] : memref<16x128xf32, #tpu.memory_space<vmem>>, vector<16x128xf32>
    %13 = arith.addf %12, %8 : vector<16x128xf32>
    %c0_7 = arith.constant 0 : index
    %c0_8 = arith.constant 0 : index
    %14 = vector.load %arg7[%c0_7, %c0_8] : memref<16x128xf32, #tpu.memory_space<vmem>>, vector<16x128xf32>
    tpu.vector_store %arg7[%c0_7, %c0_8], %13 {strides = array<i32>} : memref<16x128xf32, #tpu.memory_space<vmem>>, vector<16x128xf32>,
    return
  }
  func.func @transform_0(%arg0: i32, %arg1: i32) -> (i32, i32) {
    %c0_i32 = arith.constant 0 : i32
    %c0_i32_0 = arith.constant 0 : i32
    return %arg0, %c0_i32 : i32, i32
  }
  func.func @transform_1(%arg0: i32, %arg1: i32) -> (i32, i32) {
    %c0_i32 = arith.constant 0 : i32
    %c0_i32_0 = arith.constant 0 : i32
    %c0_i32_1 = arith.constant 0 : i32
    return %c0_i32, %c0_i32_0 : i32, i32
  }
  func.func @transform_2(%arg0: i32, %arg1: i32) -> (i32, i32) {
    %c0_i32 = arith.constant 0 : i32
    %c0_i32_0 = arith.constant 0 : i32
    %c0_i32_1 = arith.constant 0 : i32
    return %c0_i32, %c0_i32_0 : i32, i32
  }
  func.func @transform_3(%arg0: i32, %arg1: i32) -> (i32, i32) {
    %c0_i32 = arith.constant 0 : i32
    %c0_i32_0 = arith.constant 0 : i32
    return %c0_i32, %arg1 : i32, i32
  }
  func.func @transform_4(%arg0: i32, %arg1: i32) -> (i32, i32) {
    %c0_i32 = arith.constant 0 : i32
    %c0_i32_0 = arith.constant 0 : i32
    return %c0_i32, %arg1 : i32, i32
  }
  func.func @transform_5(%arg0: i32, %arg1: i32) -> (i32, i32) {
    %c0_i32 = arith.constant 0 : i32
    return %arg0, %arg1 : i32, i32
  }
}

</mosaic_0001>

<bundles_post_ra>
// kernel: sublayer_connection.1
= control target key start
LH: loop header
LB: loop body
LE: loop exit
PB: predicated region body
PF: predicated region fallthrough
CT: control target
= control target key end

     0   :  { %s384_s0 = inlined_call_operand.vmem [shape: f32[16,128], index: 0, kind: input, shape index: {}]   ;;  %s385_s1 = inlined_call_operand.vmem [shape: f32[1,128], index: 1, kind: input, shape index: {}]   ;;  %s386_s2 = inlined_call_operand.vmem [shape: f32[1,128], index: 2, kind: input, shape index: {}]   ;;  %s387_s3 = inlined_call_operand.vmem [shape: bf16[128,128], index: 3, kind: input, shape index: {}]   ;;  %s388_s4 = inlined_call_operand.vmem [shape: f32[1,128], index: 4, kind: input, shape index: {}]   ;;  %s389_s5 = inlined_call_operand.hbm [shape: f32[16,128], index: 5, kind: output, shape index: {}]  }
   0x1   :  { %v335_v0 = vld [vmem:[%s384_s0] sm:$0xff] }
   0x2   :  { %27 = vadd.xlane.f32.xlu0 %v335_v0 }
   0x3   :  { %10 = vsyncpa [#allocation4], 0  ;;  %v341_v1 = vld [vmem:[%s384_s0 + $0x8] sm:$0xff]  ;;  %v298_v2 = vmov 128.0   ;;  %v253_v17 = vld [vmem:[%s387_s3 + $0x38] sm:$0xff]  ;;  %s299_s16 = smov [#allocation3]  }
   0x4   :  { %266 = vrcp.f32 %v298_v2  ;;  %166 = vmatpush.bf16.msra.mxu0 %v253_v17  ;;  %v252_v18 = vld [vmem:[%s387_s3 + $0x30] sm:$0xff]  ;;  %v251_v19 = vld [vmem:[%s387_s3 + $0x28] sm:$0xff]  ;;  %v250_v20 = vld [vmem:[%s387_s3 + $0x20] sm:$0xff]  ;;  %s196_s19 = sshll.u32 %s389_s5, 4  ;;  %s300_s20 = smov 128   ;;  %s197_s19 = int_to_ptr.hbm [resolvable:$true] %s196_s19 }
   0x5   :  { %v249_v21 = vld [vmem:[%s387_s3 + $0x18] sm:$0xff]  ;;  %v248_v25 = vld [vmem:[%s387_s3 + $0x10] sm:$0xff]  ;;  %v247_v26 = vld [vmem:[%s387_s3 + $0x8] sm:$0xff] }
   0x6   :  { %v246_v29 = vld [vmem:[%s387_s3] sm:$0xff] }
   0x7   :  { %v263_v43 = vld [vmem:[%s385_s1] ss:$0 sm:$0xff] }
   0x8   :  { %167 = vmatpush.bf16.msra.mxu0 %v252_v18  ;;  %v264_v47 = vld [vmem:[%s386_s2] ss:$0 sm:$0xff]  ;;  %s194_s2 = sshll.u32 %s299_s16, 4  ;;  %s195_s2 = int_to_ptr.vmem [resolvable:$true] %s194_s2 }
   0x9   :  { %v265_v55 = vld [vmem:[%s388_s4] ss:$0 sm:$0xff]  ;;  %s301_s4 = smov 8  }
   0xa   :  { %29 = vadd.xlane.f32.xlu0 %v341_v1  ;;  %v267_v3 = vpop.eup %266 }
   0xb   :  { %v32_v4 = vmul.f32 128.0, %v267_v3  ;;  %vm36_vm0 = vweird.f32 %v267_v3 }
   0xc   :  { %168 = vmatpush.bf16.msra.mxu0 %v251_v19 }
   0xd   :  { %v33_v5 = vsub.f32 1.0, %v32_v4 }
   0xf   :  { %v34_v6 = vmul.f32 %v267_v3, %v33_v5 }
  0x10   :  { %169 = vmatpush.bf16.msra.mxu0 %v250_v20 }
  0x11   :  { %v35_v7 = vadd.f32 %v267_v3, %v34_v6 }
  0x13   :  { %v37_v8 = vsel %vm36_vm0, %v267_v3, %v35_v7 }
  0x14   :  { %170 = vmatpush.bf16.msra.mxu0 %v249_v21 }
  0x18   :  { %171 = vmatpush.bf16.msra.mxu0 %v248_v25 }
  0x1c   :  { %172 = vmatpush.bf16.msra.mxu0 %v247_v26 }
  0x20   :  { %173 = vmatpush.bf16.msra.mxu0 %v246_v29 }
  0x75   :  { %v28_v9 = vpop.xlane.xlu0 %27 }
  0x76   :  { %v38_v10 = vmul.f32 %v37_v8, %v28_v9 }
  0x78   :  { %v40_v11 = vsub.f32 %v335_v0, %v38_v10 }
  0x7a   :  { %v42_v12 = vmul.f32 %v40_v11, %v40_v11 }
  0x7c   :  { %44 = vadd.xlane.f32.xlu1 %v42_v12 }
  0x7d   :  { %v30_v13 = vpop.xlane.xlu0 %29 }
  0x7e   :  { %v39_v14 = vmul.f32 %v37_v8, %v30_v13 }
  0x80   :  { %v41_v15 = vsub.f32 %v341_v1, %v39_v14 }
  0x82   :  { %v43_v16 = vmul.f32 %v41_v15, %v41_v15 }
  0x84   :  { %46 = vadd.xlane.f32.xlu1 %v43_v16 }
  0xef   :  { %v45_v22 = vpop.xlane.xlu1 %44 }
  0xf0   :  { %v48_v23 = vmul.f32 %v45_v22, %v37_v8 }
  0xf2   :  { %v50_v24 = vadd.f32 1e-05, %v48_v23 }
  0xf4   :  { %268 = vrsqrt.f32 %v50_v24  ;;  %vm58_vm2 = vweird.f32 %v50_v24 }
  0xf7   :  { %v47_v27 = vpop.xlane.xlu1 %46 }
  0xf8   :  { %v49_v28 = vmul.f32 %v47_v27, %v37_v8 }
  0xfa   :  { %v269_v30 = vpop.eup %268  ;;  %v51_v31 = vadd.f32 1e-05, %v49_v28 }
  0xfb   :  { %v53_v32 = vmul.f32 %v269_v30, %v50_v24  ;;  %vm59_vm1 = vweird.f32 %v269_v30 }
  0xfc   :  { %270 = vrsqrt.f32 %v51_v31  ;;  %vm60_vm3 = vmor %vm58_vm2, %vm59_vm1  ;;  %vm68_vm5 = vweird.f32 %v51_v31 }
  0xfd   :  { %v54_v33 = vmul.f32 %v269_v30, %v53_v32 }
  0xff   :  { %v55_v34 = vmul.f32 0.5, %v54_v33 }
 0x101   :  { %v56_v35 = vsub.f32 1.5, %v55_v34 }
 0x102   :  { %v271_v36 = vpop.eup %270 }
 0x103   :  { %v57_v37 = vmul.f32 %v269_v30, %v56_v35  ;;  %v63_v38 = vmul.f32 %v271_v36, %v51_v31  ;;  %vm69_vm4 = vweird.f32 %v271_v36 }
 0x104   :  { %vm70_vm6 = vmor %vm68_vm5, %vm69_vm4 }
 0x105   :  { %v64_v39 = vmul.f32 %v271_v36, %v63_v38  ;;  %v61_v40 = vsel %vm60_vm3, %v269_v30, %v57_v37 }
 0x106   :  { %v72_v44 = vmul.f32 %v61_v40, %v40_v11 }
 0x107   :  { %v65_v41 = vmul.f32 0.5, %v64_v39 }
 0x108   :  { %v78_v48 = vmul.f32 %v263_v43, %v72_v44 }
 0x109   :  { %v66_v42 = vsub.f32 1.5, %v65_v41 }
 0x10a   :  { %v84_v51 = vadd.f32 %v264_v47, %v78_v48 }
 0x10b   :  { %v67_v45 = vmul.f32 %v271_v36, %v66_v42 }
 0x10d   :  { %v71_v46 = vsel %vm70_vm6, %v271_v36, %v67_v45 }
 0x10e   :  { %v73_v49 = vmul.f32 %v71_v46, %v41_v15 }
 0x110   :  { %v79_v50 = vmul.f32 %v263_v43, %v73_v49 }
 0x112   :  { %v85_v52 = vadd.f32 %v264_v47, %v79_v50 }
 0x114   :  { %v257_v53 = vpack.c.bf16 %v85_v52, %v84_v51 }
 0x116   :  { %258 = vst [vmem:[#allocation2] sm:$0xff] %v257_v53  }
 0x11d   :  { %v245_v54 = vld [vmem:[#allocation2] sm:$0xff] }
 0x11e   :  { %174 = vmatmul.bf16.vlgmr.msra.gmra.mxu0 %v245_v54 }
 0x19b   :  { %v175_v56 = vpop.f32.mrf.mxu0 }
 0x19c   :  { %v176_v57 = vadd.f32 %v265_v55, %v175_v56 }
 0x19e   :  { %v186_v58 = vadd.f32 %v176_v57, %v335_v0 }
 0x1a0   :  { %188 = vst [vmem:[#allocation3] sm:$0xff] %v186_v58 }
 0x1a3   :  { %v177_v59 = vpop.f32.mrf.mxu0 }
 0x1a4   :  { %v178_v60 = vadd.f32 %v265_v55, %v177_v59 }
 0x1a6   :  { %v187_v61 = vadd.f32 %v178_v60, %v341_v1 }
 0x1a8   :  { %189 = vst [vmem:[#allocation3 + $0x8] sm:$0xff] %v187_v61 }
 0x1a9   :  { %202 = dma.vmem_to_hbm [thread:$0]  %s195_s2, 256, %s197_s19, [#allocation4], %s300_s20, %s300_s20, %s301_s4  }
 0x1aa   :  { %296 = dma.done.wait [#allocation4], 256  }
 0x1ab   :  { %297 = vsyncadd [#allocation4], 4294967040 }
 0x1ac   :  { %207 = vsyncpa [#allocation4], 1 }

</bundles_post_ra>
